<compile_context>
chip_gen: v7x
topology: tpu7x:2x2x1
jax: 0.10.0
libtpu: 0.0.40
codegen_flags: <defaults>
</compile_context>

<pallas_src>
import jax
import jax.numpy as jnp
from jax import lax
from jax.experimental import pallas as pl
from jax.experimental.pallas import tpu as pltpu


# -----------------------------------------------------------------------------
# Pallas kernel: embedding gather + RNN recurrence + final linear head, fused.
# -----------------------------------------------------------------------------
def rnn_classify_kernel(ids_ref,    # (B, T)  int32 token ids       (SMEM)
                        emb_ref,    # (V, D)  embedding table       (VMEM)
                        wih_ref,    # (D, D)  = W_ih^T              (VMEM)
                        whh_ref,    # (D, D)  = W_hh^T              (VMEM)
                        b_ref,      # (1, D)  = b_ih + b_hh         (VMEM)
                        wc_ref,     # (D, S)  = W_classify^T        (VMEM)
                        bc_ref,     # (1, S)                        (VMEM)
                        out_ref,    # (B, S)  y_pred                (VMEM)
                        x_scr):     # (T*B, D) VMEM scratch: gathered embeddings
    B, T = ids_ref.shape

    # 1) In-kernel embedding gather: one dynamic row-slice per token into the
    #    scratch slab (static destination offsets, fully unrolled).
    for t in range(T):
        for bi in range(B):
            idx = ids_ref[bi, t]
            x_scr[pl.ds(t * B + bi, 1), :] = emb_ref[pl.ds(idx, 1), :]

    # 2) Input projection hoisted OFF the serial recurrence: one MXU call over
    #    all T*B rows, bias folded in here (single broadcast, outside the loop).
    pre_all = (jnp.dot(x_scr[...], wih_ref[...],
                       preferred_element_type=jnp.float32)
               + b_ref[...])                                   # (T*B, D)

    # 3) Recurrence, fully unrolled; h carried in vregs.
    #    h0 = 0 (PyTorch nn.RNN default)  =>  skip the step-0 recurrent matmul.
    whh = whh_ref[...]
    h = jnp.tanh(pre_all[0:B, :])                              # (B, D)
    for t in range(1, T):
        pre_t = pre_all[t * B:(t + 1) * B, :]                  # (B, D), static slice
        h = jnp.tanh(pre_t + jnp.dot(h, whh,
                                     preferred_element_type=jnp.float32))

    # 4) Classification head on the last hidden state: y = h_T @ Wc^T + bc.
    out_ref[...] = (jnp.dot(h, wc_ref[...],
                            preferred_element_type=jnp.float32)
                    + bc_ref[...])


def rnn_classify(x_ids, emb, w_ih_t, w_hh_t, b, w_c_t, b_c):
    B, T = x_ids.shape
    V, D = emb.shape
    S = w_c_t.shape[1]

    smem = pl.BlockSpec(memory_space=pltpu.MemorySpace.SMEM)
    vmem = pl.BlockSpec(memory_space=pltpu.MemorySpace.VMEM)

    flops = 2 * T * B * D * D            # input projection (one batched matmul)
    flops += 2 * (T - 1) * B * D * D     # recurrence h @ W_hh^T
    flops += 2 * B * D * S               # classification head
    transcendentals = T * B * D          # tanh
    bytes_accessed = 4 * (B * T + V * D + 2 * D * D + D + D * S + S + B * S)

    return pl.pallas_call(
        rnn_classify_kernel,
        out_shape=jax.ShapeDtypeStruct((B, S), jnp.float32),
        in_specs=[smem, vmem, vmem, vmem, vmem, vmem, vmem],
        out_specs=vmem,
        scratch_shapes=[pltpu.VMEM((T * B, D), jnp.float32)],
        cost_estimate=pl.CostEstimate(flops=flops,
                                      transcendentals=transcendentals,
                                      bytes_accessed=bytes_accessed),
    )(x_ids, emb, w_ih_t, w_hh_t, b, w_c_t, b_c)
    # TODO(synk): at real problem sizes (large D/S/B) pad D and S to multiples
    # of 128 / B to 8 for lane-dense tiles, cast MXU operands to bf16 on
    # v6e/v7x, and add a T-tiled grid (batch split across v7x's 2 TCs).


# -----------------------------------------------------------------------------
# Model wrapper (only tiny one-time weight reshapes/transposes remain in JAX).
# -----------------------------------------------------------------------------
def init_params(key, vocab_size, vector_dim, sentence_length):
    k1, k2, k3, k4, k5, k6, k7 = jax.random.split(key, 7)
    scale = 0.1
    emb = scale * jax.random.normal(k1, (vocab_size, vector_dim), jnp.float32)
    emb = emb.at[0].set(0.0)  # padding_idx=0
    w_ih = scale * jax.random.normal(k2, (vector_dim, vector_dim), jnp.float32)
    w_hh = scale * jax.random.normal(k3, (vector_dim, vector_dim), jnp.float32)
    b_ih = scale * jax.random.normal(k4, (vector_dim,), jnp.float32)
    b_hh = scale * jax.random.normal(k5, (vector_dim,), jnp.float32)
    w_c = scale * jax.random.normal(k6, (sentence_length, vector_dim), jnp.float32)
    b_c = scale * jax.random.normal(k7, (sentence_length,), jnp.float32)
    return dict(emb=emb, w_ih=w_ih, w_hh=w_hh, b_ih=b_ih, b_hh=b_hh,
                w_c=w_c, b_c=b_c)


def forward(params, x_ids):
    b = (params["b_ih"] + params["b_hh"]).reshape(1, -1)     # (1, D)
    b_c = params["b_c"].reshape(1, -1)                       # (1, S)
    return rnn_classify(x_ids,
                        params["emb"],
                        params["w_ih"].T,
                        params["w_hh"].T,
                        b,
                        params["w_c"].T,
                        b_c)


def forward_ref(params, x_ids):
    # pure-JAX reference mirroring PyTorch semantics, for verification
    x_emb = jnp.take(params["emb"], x_ids, axis=0)           # (B, T, D)
    B, T, D = x_emb.shape

    def step(h, x_t):
        h_new = jnp.tanh(x_t @ params["w_ih"].T + params["b_ih"]
                         + h @ params["w_hh"].T + params["b_hh"])
        return h_new, None

    h0 = jnp.zeros((B, D), jnp.float32)
    h_last, _ = lax.scan(step, h0, jnp.transpose(x_emb, (1, 0, 2)))
    return h_last @ params["w_c"].T + params["b_c"]


if __name__ == "__main__":
    vector_dim = 32
    sentence_length = 8      # also the sequence length of the input
    vocab_size = 30
    batch = 2

    key = jax.random.PRNGKey(0)
    pkey, xkey = jax.random.split(key)
    params = init_params(pkey, vocab_size, vector_dim, sentence_length)

    x_ids = jax.random.randint(xkey, (batch, sentence_length), 0, vocab_size,
                               dtype=jnp.int32)

    forward_jit = jax.jit(forward)
    y_pred = forward_jit(params, x_ids)
    y_pred = jax.block_until_ready(y_pred)

    y_ref = forward_ref(params, x_ids)
    assert y_pred.shape == (batch, sentence_length)
    assert jnp.allclose(y_pred, y_ref, atol=1e-5, rtol=1e-5), "mismatch vs reference"

    # TODO(synk): CrossEntropyLoss branch (y is not None) not implemented; the
    # request covers the inference forward pass (y_pred).
    print("KERNEL_OK")
</pallas_src>

<mosaic_0001>
module attributes {stable_mosaic.version = 11 : i64} {
  func.func @rnn_classify_kernel(%arg0: memref<2x8xi32, #tpu.memory_space<smem>>, %arg1: memref<30x32xf32, #tpu.memory_space<vmem>>, %arg2: memref<32x32xf32, #tpu.memory_space<vmem>>, %arg3: memref<32x32xf32, #tpu.memory_space<vmem>>, %arg4: memref<1x32xf32, #tpu.memory_space<vmem>>, %arg5: memref<32x8xf32, #tpu.memory_space<vmem>>, %arg6: memref<1x8xf32, #tpu.memory_space<vmem>>, %arg7: memref<2x8xf32, #tpu.memory_space<vmem>>, %arg8: memref<16x32xf32, #tpu.memory_space<vmem>>) attributes {dimension_semantics = [], scalar_prefetch = 0 : i64, scratch_operands = 1 : i64, tpu.core_type = #tpu.core_type<tc>} {
    %c0 = arith.constant 0 : index
    %c0_0 = arith.constant 0 : index
    %0 = memref.load %arg0[%c0, %c0_0] : memref<2x8xi32, #tpu.memory_space<smem>>
    %1 = arith.index_cast %0 : i32 to index
    %c0_1 = arith.constant 0 : index
    %2 = vector.load %arg1[%1, %c0_1] : memref<30x32xf32, #tpu.memory_space<vmem>>, vector<1x32xf32>
    %c0_2 = arith.constant 0 : index
    %c0_3 = arith.constant 0 : index
    %3 = vector.load %arg8[%c0_2, %c0_3] : memref<16x32xf32, #tpu.memory_space<vmem>>, vector<1x32xf32>
    tpu.vector_store %arg8[%c0_2, %c0_3], %2 {strides = array<i32>} : memref<16x32xf32, #tpu.memory_space<vmem>>, vector<1x32xf32>,
    %c1 = arith.constant 1 : index
    %c0_4 = arith.constant 0 : index
    %4 = memref.load %arg0[%c1, %c0_4] : memref<2x8xi32, #tpu.memory_space<smem>>
    %5 = arith.index_cast %4 : i32 to index
    %c0_5 = arith.constant 0 : index
    %6 = vector.load %arg1[%5, %c0_5] : memref<30x32xf32, #tpu.memory_space<vmem>>, vector<1x32xf32>
    %c1_6 = arith.constant 1 : index
    %c0_7 = arith.constant 0 : index
    %7 = vector.load %arg8[%c1_6, %c0_7] : memref<16x32xf32, #tpu.memory_space<vmem>>, vector<1x32xf32>
    tpu.vector_store %arg8[%c1_6, %c0_7], %6 {strides = array<i32>} : memref<16x32xf32, #tpu.memory_space<vmem>>, vector<1x32xf32>,
    %c0_8 = arith.constant 0 : index
    %c1_9 = arith.constant 1 : index
    %8 = memref.load %arg0[%c0_8, %c1_9] : memref<2x8xi32, #tpu.memory_space<smem>>
    %9 = arith.index_cast %8 : i32 to index
    %c0_10 = arith.constant 0 : index
    %10 = vector.load %arg1[%9, %c0_10] : memref<30x32xf32, #tpu.memory_space<vmem>>, vector<1x32xf32>
    %c2 = arith.constant 2 : index
    %c0_11 = arith.constant 0 : index
    %11 = vector.load %arg8[%c2, %c0_11] : memref<16x32xf32, #tpu.memory_space<vmem>>, vector<1x32xf32>
    tpu.vector_store %arg8[%c2, %c0_11], %10 {strides = array<i32>} : memref<16x32xf32, #tpu.memory_space<vmem>>, vector<1x32xf32>,
    %c1_12 = arith.constant 1 : index
    %c1_13 = arith.constant 1 : index
    %12 = memref.load %arg0[%c1_12, %c1_13] : memref<2x8xi32, #tpu.memory_space<smem>>
    %13 = arith.index_cast %12 : i32 to index
    %c0_14 = arith.constant 0 : index
    %14 = vector.load %arg1[%13, %c0_14] : memref<30x32xf32, #tpu.memory_space<vmem>>, vector<1x32xf32>
    %c3 = arith.constant 3 : index
    %c0_15 = arith.constant 0 : index
    %15 = vector.load %arg8[%c3, %c0_15] : memref<16x32xf32, #tpu.memory_space<vmem>>, vector<1x32xf32>
    tpu.vector_store %arg8[%c3, %c0_15], %14 {strides = array<i32>} : memref<16x32xf32, #tpu.memory_space<vmem>>, vector<1x32xf32>,
    %c0_16 = arith.constant 0 : index
    %c2_17 = arith.constant 2 : index
    %16 = memref.load %arg0[%c0_16, %c2_17] : memref<2x8xi32, #tpu.memory_space<smem>>
    %17 = arith.index_cast %16 : i32 to index
    %c0_18 = arith.constant 0 : index
    %18 = vector.load %arg1[%17, %c0_18] : memref<30x32xf32, #tpu.memory_space<vmem>>, vector<1x32xf32>
    %c4 = arith.constant 4 : index
    %c0_19 = arith.constant 0 : index
    %19 = vector.load %arg8[%c4, %c0_19] : memref<16x32xf32, #tpu.memory_space<vmem>>, vector<1x32xf32>
    tpu.vector_store %arg8[%c4, %c0_19], %18 {strides = array<i32>} : memref<16x32xf32, #tpu.memory_space<vmem>>, vector<1x32xf32>,
    %c1_20 = arith.constant 1 : index
    %c2_21 = arith.constant 2 : index
    %20 = memref.load %arg0[%c1_20, %c2_21] : memref<2x8xi32, #tpu.memory_space<smem>>
    %21 = arith.index_cast %20 : i32 to index
    %c0_22 = arith.constant 0 : index
    %22 = vector.load %arg1[%21, %c0_22] : memref<30x32xf32, #tpu.memory_space<vmem>>, vector<1x32xf32>
    %c5 = arith.constant 5 : index
    %c0_23 = arith.constant 0 : index
    %23 = vector.load %arg8[%c5, %c0_23] : memref<16x32xf32, #tpu.memory_space<vmem>>, vector<1x32xf32>
    tpu.vector_store %arg8[%c5, %c0_23], %22 {strides = array<i32>} : memref<16x32xf32, #tpu.memory_space<vmem>>, vector<1x32xf32>,
    %c0_24 = arith.constant 0 : index
    %c3_25 = arith.constant 3 : index
    %24 = memref.load %arg0[%c0_24, %c3_25] : memref<2x8xi32, #tpu.memory_space<smem>>
    %25 = arith.index_cast %24 : i32 to index
    %c0_26 = arith.constant 0 : index
    %26 = vector.load %arg1[%25, %c0_26] : memref<30x32xf32, #tpu.memory_space<vmem>>, vector<1x32xf32>
    %c6 = arith.constant 6 : index
    %c0_27 = arith.constant 0 : index
    %27 = vector.load %arg8[%c6, %c0_27] : memref<16x32xf32, #tpu.memory_space<vmem>>, vector<1x32xf32>
    tpu.vector_store %arg8[%c6, %c0_27], %26 {strides = array<i32>} : memref<16x32xf32, #tpu.memory_space<vmem>>, vector<1x32xf32>,
    %c1_28 = arith.constant 1 : index
    %c3_29 = arith.constant 3 : index
    %28 = memref.load %arg0[%c1_28, %c3_29] : memref<2x8xi32, #tpu.memory_space<smem>>
    %29 = arith.index_cast %28 : i32 to index
    %c0_30 = arith.constant 0 : index
    %30 = vector.load %arg1[%29, %c0_30] : memref<30x32xf32, #tpu.memory_space<vmem>>, vector<1x32xf32>
    %c7 = arith.constant 7 : index
    %c0_31 = arith.constant 0 : index
    %31 = vector.load %arg8[%c7, %c0_31] : memref<16x32xf32, #tpu.memory_space<vmem>>, vector<1x32xf32>
    tpu.vector_store %arg8[%c7, %c0_31], %30 {strides = array<i32>} : memref<16x32xf32, #tpu.memory_space<vmem>>, vector<1x32xf32>,
    %c0_32 = arith.constant 0 : index
    %c4_33 = arith.constant 4 : index
    %32 = memref.load %arg0[%c0_32, %c4_33] : memref<2x8xi32, #tpu.memory_space<smem>>
    %33 = arith.index_cast %32 : i32 to index
    %c0_34 = arith.constant 0 : index
    %34 = vector.load %arg1[%33, %c0_34] : memref<30x32xf32, #tpu.memory_space<vmem>>, vector<1x32xf32>
    %c8 = arith.constant 8 : index
    %c0_35 = arith.constant 0 : index
    %35 = vector.load %arg8[%c8, %c0_35] : memref<16x32xf32, #tpu.memory_space<vmem>>, vector<1x32xf32>
    tpu.vector_store %arg8[%c8, %c0_35], %34 {strides = array<i32>} : memref<16x32xf32, #tpu.memory_space<vmem>>, vector<1x32xf32>,
    %c1_36 = arith.constant 1 : index
    %c4_37 = arith.constant 4 : index
    %36 = memref.load %arg0[%c1_36, %c4_37] : memref<2x8xi32, #tpu.memory_space<smem>>
    %37 = arith.index_cast %36 : i32 to index
    %c0_38 = arith.constant 0 : index
    %38 = vector.load %arg1[%37, %c0_38] : memref<30x32xf32, #tpu.memory_space<vmem>>, vector<1x32xf32>
    %c9 = arith.constant 9 : index
    %c0_39 = arith.constant 0 : index
    %39 = vector.load %arg8[%c9, %c0_39] : memref<16x32xf32, #tpu.memory_space<vmem>>, vector<1x32xf32>
    tpu.vector_store %arg8[%c9, %c0_39], %38 {strides = array<i32>} : memref<16x32xf32, #tpu.memory_space<vmem>>, vector<1x32xf32>,
    %c0_40 = arith.constant 0 : index
    %c5_41 = arith.constant 5 : index
    %40 = memref.load %arg0[%c0_40, %c5_41] : memref<2x8xi32, #tpu.memory_space<smem>>
    %41 = arith.index_cast %40 : i32 to index
    %c0_42 = arith.constant 0 : index
    %42 = vector.load %arg1[%41, %c0_42] : memref<30x32xf32, #tpu.memory_space<vmem>>, vector<1x32xf32>
    %c10 = arith.constant 10 : index
    %c0_43 = arith.constant 0 : index
    %43 = vector.load %arg8[%c10, %c0_43] : memref<16x32xf32, #tpu.memory_space<vmem>>, vector<1x32xf32>
    tpu.vector_store %arg8[%c10, %c0_43], %42 {strides = array<i32>} : memref<16x32xf32, #tpu.memory_space<vmem>>, vector<1x32xf32>,
    %c1_44 = arith.constant 1 : index
    %c5_45 = arith.constant 5 : index
    %44 = memref.load %arg0[%c1_44, %c5_45] : memref<2x8xi32, #tpu.memory_space<smem>>
    %45 = arith.index_cast %44 : i32 to index
    %c0_46 = arith.constant 0 : index
    %46 = vector.load %arg1[%45, %c0_46] : memref<30x32xf32, #tpu.memory_space<vmem>>, vector<1x32xf32>
    %c11 = arith.constant 11 : index
    %c0_47 = arith.constant 0 : index
    %47 = vector.load %arg8[%c11, %c0_47] : memref<16x32xf32, #tpu.memory_space<vmem>>, vector<1x32xf32>
    tpu.vector_store %arg8[%c11, %c0_47], %46 {strides = array<i32>} : memref<16x32xf32, #tpu.memory_space<vmem>>, vector<1x32xf32>,
    %c0_48 = arith.constant 0 : index
    %c6_49 = arith.constant 6 : index
    %48 = memref.load %arg0[%c0_48, %c6_49] : memref<2x8xi32, #tpu.memory_space<smem>>
    %49 = arith.index_cast %48 : i32 to index
    %c0_50 = arith.constant 0 : index
    %50 = vector.load %arg1[%49, %c0_50] : memref<30x32xf32, #tpu.memory_space<vmem>>, vector<1x32xf32>
    %c12 = arith.constant 12 : index
    %c0_51 = arith.constant 0 : index
    %51 = vector.load %arg8[%c12, %c0_51] : memref<16x32xf32, #tpu.memory_space<vmem>>, vector<1x32xf32>
    tpu.vector_store %arg8[%c12, %c0_51], %50 {strides = array<i32>} : memref<16x32xf32, #tpu.memory_space<vmem>>, vector<1x32xf32>,
    %c1_52 = arith.constant 1 : index
    %c6_53 = arith.constant 6 : index
    %52 = memref.load %arg0[%c1_52, %c6_53] : memref<2x8xi32, #tpu.memory_space<smem>>
    %53 = arith.index_cast %52 : i32 to index
    %c0_54 = arith.constant 0 : index
    %54 = vector.load %arg1[%53, %c0_54] : memref<30x32xf32, #tpu.memory_space<vmem>>, vector<1x32xf32>
    %c13 = arith.constant 13 : index
    %c0_55 = arith.constant 0 : index
    %55 = vector.load %arg8[%c13, %c0_55] : memref<16x32xf32, #tpu.memory_space<vmem>>, vector<1x32xf32>
    tpu.vector_store %arg8[%c13, %c0_55], %54 {strides = array<i32>} : memref<16x32xf32, #tpu.memory_space<vmem>>, vector<1x32xf32>,
    %c0_56 = arith.constant 0 : index
    %c7_57 = arith.constant 7 : index
    %56 = memref.load %arg0[%c0_56, %c7_57] : memref<2x8xi32, #tpu.memory_space<smem>>
    %57 = arith.index_cast %56 : i32 to index
    %c0_58 = arith.constant 0 : index
    %58 = vector.load %arg1[%57, %c0_58] : memref<30x32xf32, #tpu.memory_space<vmem>>, vector<1x32xf32>
    %c14 = arith.constant 14 : index
    %c0_59 = arith.constant 0 : index
    %59 = vector.load %arg8[%c14, %c0_59] : memref<16x32xf32, #tpu.memory_space<vmem>>, vector<1x32xf32>
    tpu.vector_store %arg8[%c14, %c0_59], %58 {strides = array<i32>} : memref<16x32xf32, #tpu.memory_space<vmem>>, vector<1x32xf32>,
    %c1_60 = arith.constant 1 : index
    %c7_61 = arith.constant 7 : index
    %60 = memref.load %arg0[%c1_60, %c7_61] : memref<2x8xi32, #tpu.memory_space<smem>>
    %61 = arith.index_cast %60 : i32 to index
    %c0_62 = arith.constant 0 : index
    %62 = vector.load %arg1[%61, %c0_62] : memref<30x32xf32, #tpu.memory_space<vmem>>, vector<1x32xf32>
    %c15 = arith.constant 15 : index
    %c0_63 = arith.constant 0 : index
    %63 = vector.load %arg8[%c15, %c0_63] : memref<16x32xf32, #tpu.memory_space<vmem>>, vector<1x32xf32>
    tpu.vector_store %arg8[%c15, %c0_63], %62 {strides = array<i32>} : memref<16x32xf32, #tpu.memory_space<vmem>>, vector<1x32xf32>,
    %c0_64 = arith.constant 0 : index
    %c0_65 = arith.constant 0 : index
    %64 = vector.load %arg8[%c0_64, %c0_65] : memref<16x32xf32, #tpu.memory_space<vmem>>, vector<16x32xf32>
    %c0_66 = arith.constant 0 : index
    %c0_67 = arith.constant 0 : index
    %65 = vector.load %arg2[%c0_66, %c0_67] : memref<32x32xf32, #tpu.memory_space<vmem>>, vector<32x32xf32>
    %cst = arith.constant dense<0.000000e+00> : vector<16x32xf32>
    %66 = tpu.matmul %64, %65, %cst {dimension_numbers = #tpu.dot_dimension_numbers<[1], [0], [0], [1], [0, 0, 1, 1], [], []>} : vector<16x32xf32>, vector<32x32xf32>, vector<16x32xf32> -> vector<16x32xf32>
    %c0_68 = arith.constant 0 : index
    %c0_69 = arith.constant 0 : index
    %67 = vector.load %arg4[%c0_68, %c0_69] : memref<1x32xf32, #tpu.memory_space<vmem>>, vector<1x32xf32>
    %68 = vector.broadcast %67 : vector<1x32xf32> to vector<16x32xf32>
    %69 = arith.addf %66, %68 : vector<16x32xf32>
    %c0_70 = arith.constant 0 : index
    %c0_71 = arith.constant 0 : index
    %70 = vector.load %arg3[%c0_70, %c0_71] : memref<32x32xf32, #tpu.memory_space<vmem>>, vector<32x32xf32>
    %71 = vector.extract_strided_slice %69 {offsets = [0, 0], sizes = [2, 32], strides = [1, 1]} : vector<16x32xf32> to vector<2x32xf32>
    %72 = math.tanh %71 : vector<2x32xf32>
    %73 = vector.extract_strided_slice %69 {offsets = [2, 0], sizes = [2, 32], strides = [1, 1]} : vector<16x32xf32> to vector<2x32xf32>
    %cst_72 = arith.constant dense<0.000000e+00> : vector<2x32xf32>
    %74 = tpu.matmul %72, %70, %cst_72 {dimension_numbers = #tpu.dot_dimension_numbers<[1], [0], [0], [1], [0, 0, 1, 1], [], []>} : vector<2x32xf32>, vector<32x32xf32>, vector<2x32xf32> -> vector<2x32xf32>
    %75 = arith.addf %73, %74 : vector<2x32xf32>
    %76 = math.tanh %75 : vector<2x32xf32>
    %77 = vector.extract_strided_slice %69 {offsets = [4, 0], sizes = [2, 32], strides = [1, 1]} : vector<16x32xf32> to vector<2x32xf32>
    %cst_73 = arith.constant dense<0.000000e+00> : vector<2x32xf32>
    %78 = tpu.matmul %76, %70, %cst_73 {dimension_numbers = #tpu.dot_dimension_numbers<[1], [0], [0], [1], [0, 0, 1, 1], [], []>} : vector<2x32xf32>, vector<32x32xf32>, vector<2x32xf32> -> vector<2x32xf32>
    %79 = arith.addf %77, %78 : vector<2x32xf32>
    %80 = math.tanh %79 : vector<2x32xf32>
    %81 = vector.extract_strided_slice %69 {offsets = [6, 0], sizes = [2, 32], strides = [1, 1]} : vector<16x32xf32> to vector<2x32xf32>
    %cst_74 = arith.constant dense<0.000000e+00> : vector<2x32xf32>
    %82 = tpu.matmul %80, %70, %cst_74 {dimension_numbers = #tpu.dot_dimension_numbers<[1], [0], [0], [1], [0, 0, 1, 1], [], []>} : vector<2x32xf32>, vector<32x32xf32>, vector<2x32xf32> -> vector<2x32xf32>
    %83 = arith.addf %81, %82 : vector<2x32xf32>
    %84 = math.tanh %83 : vector<2x32xf32>
    %85 = vector.extract_strided_slice %69 {offsets = [8, 0], sizes = [2, 32], strides = [1, 1]} : vector<16x32xf32> to vector<2x32xf32>
    %cst_75 = arith.constant dense<0.000000e+00> : vector<2x32xf32>
    %86 = tpu.matmul %84, %70, %cst_75 {dimension_numbers = #tpu.dot_dimension_numbers<[1], [0], [0], [1], [0, 0, 1, 1], [], []>} : vector<2x32xf32>, vector<32x32xf32>, vector<2x32xf32> -> vector<2x32xf32>
    %87 = arith.addf %85, %86 : vector<2x32xf32>
    %88 = math.tanh %87 : vector<2x32xf32>
    %89 = vector.extract_strided_slice %69 {offsets = [10, 0], sizes = [2, 32], strides = [1, 1]} : vector<16x32xf32> to vector<2x32xf32>
    %cst_76 = arith.constant dense<0.000000e+00> : vector<2x32xf32>
    %90 = tpu.matmul %88, %70, %cst_76 {dimension_numbers = #tpu.dot_dimension_numbers<[1], [0], [0], [1], [0, 0, 1, 1], [], []>} : vector<2x32xf32>, vector<32x32xf32>, vector<2x32xf32> -> vector<2x32xf32>
    %91 = arith.addf %89, %90 : vector<2x32xf32>
    %92 = math.tanh %91 : vector<2x32xf32>
    %93 = vector.extract_strided_slice %69 {offsets = [12, 0], sizes = [2, 32], strides = [1, 1]} : vector<16x32xf32> to vector<2x32xf32>
    %cst_77 = arith.constant dense<0.000000e+00> : vector<2x32xf32>
    %94 = tpu.matmul %92, %70, %cst_77 {dimension_numbers = #tpu.dot_dimension_numbers<[1], [0], [0], [1], [0, 0, 1, 1], [], []>} : vector<2x32xf32>, vector<32x32xf32>, vector<2x32xf32> -> vector<2x32xf32>
    %95 = arith.addf %93, %94 : vector<2x32xf32>
    %96 = math.tanh %95 : vector<2x32xf32>
    %97 = vector.extract_strided_slice %69 {offsets = [14, 0], sizes = [2, 32], strides = [1, 1]} : vector<16x32xf32> to vector<2x32xf32>
    %cst_78 = arith.constant dense<0.000000e+00> : vector<2x32xf32>
    %98 = tpu.matmul %96, %70, %cst_78 {dimension_numbers = #tpu.dot_dimension_numbers<[1], [0], [0], [1], [0, 0, 1, 1], [], []>} : vector<2x32xf32>, vector<32x32xf32>, vector<2x32xf32> -> vector<2x32xf32>
    %99 = arith.addf %97, %98 : vector<2x32xf32>
    %100 = math.tanh %99 : vector<2x32xf32>
    %c0_79 = arith.constant 0 : index
    %c0_80 = arith.constant 0 : index
    %101 = vector.load %arg5[%c0_79, %c0_80] : memref<32x8xf32, #tpu.memory_space<vmem>>, vector<32x8xf32>
    %cst_81 = arith.constant dense<0.000000e+00> : vector<2x8xf32>
    %102 = tpu.matmul %100, %101, %cst_81 {dimension_numbers = #tpu.dot_dimension_numbers<[1], [0], [0], [1], [0, 0, 1, 1], [], []>} : vector<2x32xf32>, vector<32x8xf32>, vector<2x8xf32> -> vector<2x8xf32>
    %c0_82 = arith.constant 0 : index
    %c0_83 = arith.constant 0 : index
    %103 = vector.load %arg6[%c0_82, %c0_83] : memref<1x8xf32, #tpu.memory_space<vmem>>, vector<1x8xf32>
    %104 = vector.broadcast %103 : vector<1x8xf32> to vector<2x8xf32>
    %105 = arith.addf %102, %104 : vector<2x8xf32>
    %c0_84 = arith.constant 0 : index
    %c0_85 = arith.constant 0 : index
    %106 = vector.load %arg7[%c0_84, %c0_85] : memref<2x8xf32, #tpu.memory_space<vmem>>, vector<2x8xf32>
    tpu.vector_store %arg7[%c0_84, %c0_85], %105 {strides = array<i32>} : memref<2x8xf32, #tpu.memory_space<vmem>>, vector<2x8xf32>,
    return
  }
}

</mosaic_0001>

<bundles_post_ra>
// kernel: forward.1
= control target key start
LH: loop header
LB: loop body
LE: loop exit
PB: predicated region body
PF: predicated region fallthrough
CT: control target
= control target key end

     0   :  { %12 = vsyncpa [#allocation5], 0  ;;  %s1405_s0 = inlined_call_operand.vmem [shape: s32[2,8], index: 0, kind: input, shape index: {}]   ;;  %s1406_s1 = inlined_call_operand.vmem [shape: f32[30,32], index: 1, kind: input, shape index: {}]   ;;  %s1407_s2 = inlined_call_operand.vmem [shape: f32[32,32], index: 2, kind: input, shape index: {}]   ;;  %s1408_s3 = inlined_call_operand.vmem [shape: f32[32,32], index: 3, kind: input, shape index: {}]   ;;  %s1409_s4 = inlined_call_operand.vmem [shape: f32[1,32], index: 4, kind: input, shape index: {}]   ;;  %s1410_s5 = inlined_call_operand.vmem [shape: f32[32,8], index: 5, kind: input, shape index: {}]   ;;  %s1411_s6 = inlined_call_operand.vmem [shape: f32[1,8], index: 6, kind: input, shape index: {}]   ;;  %s1412_s7 = inlined_call_operand.hbm [shape: f32[2,8], index: 7, kind: output, shape index: {}]  }
   0x1   :  { %13 = vsyncpa [#allocation4], 0  ;;  %s20_s26 = sshll.u32 %s1405_s0, 4  ;;  %s21_s26 = int_to_ptr.vmem [resolvable:$true] %s20_s26 }
   0x2   :  { %s1120_s27 = scalar_lea.vmem %s21_s26, 32  ;;  %p1125_p1 = scmp.lt.s32.totalorder %s21_s26, %s21_s26 }
   0x3   :  { %p1121_p0 = scmp.ne.s32.totalorder %s21_s26, %s1120_s27  ;;  %p1126_p2 = scmp.lt.s32.totalorder %s1120_s27, %s1120_s27 }
   0x5   :  { %p1127_p3 = por %p1126_p2, %p1125_p1 }
   0x7   :  { %p1128_p4 = pnand %p1127_p3, %p1121_p0 }
   0x9   :  { %1131 = shalt.err (!%p1128_p4)
}
   0xa   :  { %s1158_s28 = smov [#allocation3]  }
   0xb   :  { %23 = dma.vmem_to_smem %s21_s26, 32, %s1158_s28, [#allocation5]  }
   0xc   :  { %1154 = dma.done.wait [#allocation5], 32  }
   0xd   :  { %1155 = vsyncadd [#allocation5], 4294967264 }
   0xe   :  { %39 = sfence }
   0xf   :  { %v107_v0 = vld [vmem:[%s1407_s2] sm:$0xff]  ;;  %v108_v1 = vld [vmem:[%s1407_s2 + $0x8] sm:$0xff]  ;;  %v109_v2 = vld [vmem:[%s1407_s2 + $0x10] sm:$0xff]  ;;  %s40_s11 = sld [smem:[#allocation3]]  ;;  %s872_s15 = sld [smem:[#allocation3 + $0x1]]  ;;  %vm43_vm0 = vcmask 253952  }
  0x10   :  { %v1043_v3 = vpack.c.bf16 %v108_v1, %v107_v0  ;;  %v110_v4 = vld [vmem:[%s1407_s2 + $0x18] sm:$0xff]  ;;  %s871_s14 = sld [smem:[#allocation3 + $0x80]]  ;;  %s873_s16 = sld [smem:[#allocation3 + $0x81]]  ;;  %vm118_vm1 = vcmask 261120   ;;  %v200_v24 = vld [vmem:[%s1408_s3] sm:$0xff]  ;;  %v201_v25 = vld [vmem:[%s1408_s3 + $0x8] sm:$0xff] }
  0x11   :  { %v1047_v5 = vpack.c.bf16 %v110_v4, %v109_v2  ;;  %s874_s17 = sld [smem:[#allocation3 + $0x2]]  ;;  %s876_s19 = sld [smem:[#allocation3 + $0x3]]  ;;  %v202_v26 = vld [vmem:[%s1408_s3 + $0x10] sm:$0xff]  ;;  %v1159_v27 = vmov 0.0|0.0   ;;  %v1309_v28 = vpack.c.bf16 %v201_v25, %v200_v24  ;;  %v203_v29 = vld [vmem:[%s1408_s3 + $0x18] sm:$0xff]  ;;  %vm1160_vm2 = vmmov 0  }
  0x12   :  { %1044 = vmatprep.subr.bf16.mxu0 %v1043_v3  ;;  %s875_s18 = sld [smem:[#allocation3 + $0x82]]  ;;  %s1218_s20 = sld [smem:[#allocation3 + $0x83]]  ;;  %1051 = vmatprep.subr.bf16.mxu1 %v1159_v27  ;;  %v1161_v30 = vmov 0.0   ;;  %v1320_v31 = vpack.c.bf16 %v203_v29, %v202_v26  ;;  %v886_v32 = vld [vmem:[%s1409_s4] ss:$0 sm:$0xff]  ;;  %vm838_vm3 = vcmask 58368  }
  0x13   :  { %1046 = vmatpush3.bf16.msra.mxu0 %v1043_v3  ;;  %s1220_s21 = sld [smem:[#allocation3 + $0x4]]  ;;  %s1224_s23 = sld [smem:[#allocation3 + $0x5]]  ;;  %963 = vmatprep.mubr.msk.f32.mxu1 %vm1160_vm2, %v1161_v30 }
  0x14   :  { %1048 = vmatprep.subr.bf16.mxu0 %v1047_v5  ;;  %s1222_s22 = sld [smem:[#allocation3 + $0x84]]  ;;  %s1229_s26 = sld [smem:[#allocation3 + $0x85]]  ;;  %1053 = vmatpush3.bf16.msra.mxu1 %v1309_v28 }
  0x15   :  { %s41_s25 = scalar_lea.vmem %s1406_s1, %s40_s11  ;;  %s50_s9 = scalar_lea.vmem %s1406_s1, %s872_s15  ;;  %1054 = vmatprep.subr.bf16.mxu1 %v1159_v27 }
  0x16   :  { %v42_v6 = vld [vmem:[%s41_s25] sm:$0x1]  ;;  %s46_s29 = scalar_lea.vmem %s1406_s1, %s871_s14  ;;  %s54_s11 = scalar_lea.vmem %s1406_s1, %s873_s16 }
  0x17   :  { %1050 = vmatpush3.bf16.msra.mxu0 %v1047_v5  ;;  %44 = vst.msk [vmem:[#allocation2] sm:$0x1] %vm43_vm0, %v42_v6  ;;  %v47_v7 = vld [vmem:[%s46_s29] sm:$0x1]  ;;  %s58_s2 = scalar_lea.vmem %s1406_s1, %s874_s17  ;;  %s66_s16 = scalar_lea.vmem %s1406_s1, %s876_s19 }
  0x18   :  { %v51_v8 = vld [vmem:[%s50_s9] sm:$0x1]  ;;  %48 = vst.msk [vmem:[#allocation2 + $0x1] sm:$0x1] %vm43_vm0, %v47_v7  ;;  %s62_s24 = scalar_lea.vmem %s1406_s1, %s875_s18  ;;  %s70_s29 = scalar_lea.vmem %s1406_s1, %s1218_s20  ;;  %1057 = vmatprep.subr.bf16.mxu0 %v1159_v27  ;;  %1056 = vmatpush3.bf16.msra.mxu1 %v1320_v31 }
  0x19   :  { %52 = vst.msk [vmem:[#allocation2 + $0x2] sm:$0x1] %vm43_vm0, %v51_v8  ;;  %v55_v9 = vld [vmem:[%s54_s11] sm:$0x1]  ;;  %s74_s9 = scalar_lea.vmem %s1406_s1, %s1220_s21  ;;  %s82_s12 = scalar_lea.vmem %s1406_s1, %s1224_s23  ;;  %1063 = vmatprep.subr.bf16.mxu1 %v1159_v27 }
  0x1a   :  { %v59_v10 = vld [vmem:[%s58_s2] sm:$0x1]  ;;  %56 = vst.msk [vmem:[#allocation2 + $0x3] sm:$0x1] %vm43_vm0, %v55_v9  ;;  %s78_s0 = scalar_lea.vmem %s1406_s1, %s1222_s22  ;;  %s86_s13 = scalar_lea.vmem %s1406_s1, %s1229_s26  ;;  %v754_v9 = vld [vmem:[%s1410_s5 + $0x8] sm:$0xff] }
  0x1b   :  { %60 = vst.msk [vmem:[#allocation2 + $0x4] sm:$0x1] %vm43_vm0, %v59_v10  ;;  %v63_v11 = vld [vmem:[%s62_s24] sm:$0x1]  ;;  %s882_s2 = sld [smem:[#allocation3 + $0x6]]  ;;  %s884_s14 = sld [smem:[#allocation3 + $0x7]] }
  0x1c   :  { %v67_v12 = vld [vmem:[%s66_s16] sm:$0x1]  ;;  %64 = vst.msk [vmem:[#allocation2 + $0x5] sm:$0x1] %vm43_vm0, %v63_v11  ;;  %s883_s22 = sld [smem:[#allocation3 + $0x86]]  ;;  %s885_s23 = sld [smem:[#allocation3 + $0x87]] }
  0x1d   :  { %68 = vst.msk [vmem:[#allocation2 + $0x6] sm:$0x1] %vm43_vm0, %v67_v12  ;;  %v71_v13 = vld [vmem:[%s70_s29] sm:$0x1]  ;;  %v755_v11 = vld [vmem:[%s1410_s5 + $0x10] sm:$0xff]  ;;  %v756_v12 = vld [vmem:[%s1410_s5 + $0x18] sm:$0xff] }
  0x1e   :  { %v75_v14 = vld [vmem:[%s74_s9] sm:$0x1]  ;;  %72 = vst.msk [vmem:[#allocation2 + $0x7] sm:$0x1] %vm43_vm0, %v71_v13  ;;  %v1097_v13 = vpack.c.bf16 %v756_v12, %v755_v11  ;;  %s1162_s26 = smov [#allocation6]  }
  0x1f   :  { %76 = vst.msk [vmem:[#allocation2 + $0x8] sm:$0x1] %vm43_vm0, %v75_v14  ;;  %v79_v15 = vld [vmem:[%s78_s0] sm:$0x1] }
  0x20   :  { %v83_v16 = vld [vmem:[%s82_s12] sm:$0x1]  ;;  %80 = vst.msk [vmem:[#allocation2 + $0x9] sm:$0x1] %vm43_vm0, %v79_v15 }
  0x21   :  { %84 = vst.msk [vmem:[#allocation2 + $0xa] sm:$0x1] %vm43_vm0, %v83_v16  ;;  %v87_v17 = vld [vmem:[%s86_s13] sm:$0x1]  ;;  %s90_s25 = scalar_lea.vmem %s1406_s1, %s882_s2  ;;  %s98_s29 = scalar_lea.vmem %s1406_s1, %s884_s14 }
  0x22   :  { %88 = vst.msk [vmem:[#allocation2 + $0xb] sm:$0x1] %vm43_vm0, %v87_v17  ;;  %v91_v19 = vld [vmem:[%s90_s25] sm:$0x1]  ;;  %s94_s16 = scalar_lea.vmem %s1406_s1, %s883_s22  ;;  %s102_s9 = scalar_lea.vmem %s1406_s1, %s885_s23 }
  0x23   :  { %92 = vst.msk [vmem:[#allocation2 + $0xc] sm:$0x1] %vm43_vm0, %v91_v19  ;;  %v95_v20 = vld [vmem:[%s94_s16] sm:$0x1]  ;;  %s846_s16 = sshll.u32 %s1162_s26, 4  ;;  %s847_s16 = int_to_ptr.vmem [resolvable:$true] %s846_s16 }
  0x24   :  { %v99_v21 = vld [vmem:[%s98_s29] sm:$0x1]  ;;  %96 = vst.msk [vmem:[#allocation2 + $0xd] sm:$0x1] %vm43_vm0, %v95_v20  ;;  %p1137_p6 = scmp.lt.s32.totalorder %s847_s16, %s847_s16 }
  0x25   :  { %v105_v18 = vld [vmem:[#allocation2] sm:$0xff]  ;;  %100 = vst.msk [vmem:[#allocation2 + $0xe] sm:$0x1] %vm43_vm0, %v99_v21 }
  0x26   :  { %952 = vmatprep.mubr.msk.f32.mxu0 %vm118_vm1, %v105_v18  ;;  %v103_v22 = vld [vmem:[%s102_s9] sm:$0x1] }
  0x27   :  { %104 = vst.msk [vmem:[#allocation2 + $0xf] sm:$0x1] %vm43_vm0, %v103_v22  ;;  %v753_v8 = vld [vmem:[%s1410_s5] sm:$0xff]  ;;  %s1132_s5 = scalar_lea.vmem %s847_s16, 32 }
  0x28   :  { %v1094_v10 = vpack.c.bf16 %v754_v9, %v753_v8  ;;  %v896_v20 = vld [vmem:[%s1411_s6] ss:$0 sm:$0xff]  ;;  %p1133_p5 = scmp.ne.s32.totalorder %s847_s16, %s1132_s5  ;;  %p1138_p7 = scmp.lt.s32.totalorder %s1132_s5, %s1132_s5 }
  0x2a   :  { %p1139_p8 = por %p1138_p7, %p1137_p6 }
  0x2c   :  { %p1140_p9 = pnand %p1139_p8, %p1133_p5 }
  0x2e   :  { %v106_v23 = vld [vmem:[#allocation2 + $0x8] sm:$0xff] }
  0x2f   :  { %953 = vmatmul.mubr.msk.f32.vlgmr.msra.gmra.mrb[0].mxu0 %vm118_vm1, %v106_v23 }
  0x30   :  { %974 = vmatprep.mubr.msk.f32.mxu0 %vm1160_vm2, %v1161_v30  ;;  %1059 = vmatpush3.bf16.msra.mxu0 %v1309_v28 }
  0x31   :  { %1060 = vmatprep.subr.bf16.mxu0 %v1159_v27 }
  0x34   :  { %1062 = vmatpush3.bf16.msra.mxu0 %v1320_v31 }
  0x35   :  { %1069 = vmatprep.subr.bf16.mxu0 %v1159_v27 }
 0x102   :  { %v954_v33 = vpop.f32.mrb[0].mxu0 }
 0x103   :  { %v1332_v34 = vadd.f32 %v954_v33, %v886_v32  ;;  %v191_v35 = vpop.f32.mrb[1].mxu0 }
 0x104   :  { %v192_v36 = vadd.f32 %v886_v32, %v191_v35 }
 0x106   :  { %1104 = vtanh.f32 %v192_v36 }
 0x110   :  { %v1105_v37 = vpop.eup %1104 }
 0x111   :  { %964 = vmatmul.mubr.msk.f32.vlgmr.msra.gmra.mrb[0].mxu1 %vm118_vm1, %v1105_v37 }
 0x112   :  { %1065 = vmatpush3.bf16.msra.mxu1 %v1309_v28  ;;  %985 = vmatprep.mubr.msk.f32.mxu1 %vm1160_vm2, %v1161_v30 }
 0x113   :  { %1066 = vmatprep.subr.bf16.mxu1 %v1159_v27 }
 0x116   :  { %1068 = vmatpush3.bf16.msra.mxu1 %v1320_v31 }
 0x117   :  { %1075 = vmatprep.subr.bf16.mxu1 %v1159_v27 }
 0x1e4   :  { %v274_v38 = vpop.f32.mrb[0].mxu1 }
 0x1e5   :  { %v279_v39 = vrot.slane %v274_v38, 6  ;;  %v965_v40 = vpop.f32.mrb[1].mxu1 }
 0x1e7   :  { %v281_v41 = vadd.f32 %v279_v39, %v192_v36 }
 0x1e9   :  { %1106 = vtanh.f32 %v281_v41 }
 0x1f3   :  { %v1107_v42 = vpop.eup %1106 }
 0x1f4   :  { %v284_v43 = vrot.slane %v1107_v42, 2 }
 0x1f6   :  { %975 = vmatmul.mubr.msk.f32.vlgmr.msra.gmra.mrb[2].mxu0 %vm118_vm1, %v284_v43 }
 0x1f7   :  { %1071 = vmatpush3.bf16.msra.mxu0 %v1309_v28  ;;  %996 = vmatprep.mubr.msk.f32.mxu0 %vm1160_vm2, %v1161_v30 }
 0x1f8   :  { %1072 = vmatprep.subr.bf16.mxu0 %v1159_v27 }
 0x1fb   :  { %1074 = vmatpush3.bf16.msra.mxu0 %v1320_v31 }
 0x1fc   :  { %1081 = vmatprep.subr.bf16.mxu0 %v1159_v27 }
 0x2c9   :  { %v353_v44 = vpop.f32.mrb[2].mxu0 }
 0x2ca   :  { %v358_v45 = vrot.slane %v353_v44, 4  ;;  %v976_v46 = vpop.f32.mrb[3].mxu0 }
 0x2cc   :  { %v360_v47 = vadd.f32 %v358_v45, %v192_v36 }
 0x2ce   :  { %1108 = vtanh.f32 %v360_v47 }
 0x2d8   :  { %v1109_v48 = vpop.eup %1108 }
 0x2d9   :  { %v363_v49 = vrot.slane %v1109_v48, 4 }
 0x2db   :  { %986 = vmatmul.mubr.msk.f32.vlgmr.msra.gmra.mrb[2].mxu1 %vm118_vm1, %v363_v49 }
 0x2dc   :  { %1077 = vmatpush3.bf16.msra.mxu1 %v1309_v28  ;;  %1007 = vmatprep.mubr.msk.f32.mxu1 %vm1160_vm2, %v1161_v30 }
 0x2dd   :  { %1078 = vmatprep.subr.bf16.mxu1 %v1159_v27 }
 0x2e0   :  { %1080 = vmatpush3.bf16.msra.mxu1 %v1320_v31 }
 0x2e1   :  { %1087 = vmatprep.subr.bf16.mxu1 %v1159_v27 }
 0x3ae   :  { %v432_v50 = vpop.f32.mrb[2].mxu1 }
 0x3af   :  { %v437_v51 = vrot.slane %v432_v50, 2  ;;  %v987_v52 = vpop.f32.mrb[3].mxu1 }
 0x3b1   :  { %v439_v53 = vadd.f32 %v437_v51, %v192_v36 }
 0x3b3   :  { %1110 = vtanh.f32 %v439_v53 }
 0x3bd   :  { %v1111_v54 = vpop.eup %1110 }
 0x3be   :  { %v442_v55 = vrot.slane %v1111_v54, 6 }
 0x3c0   :  { %997 = vmatmul.mubr.msk.f32.vlgmr.msra.gmra.mrb[4].mxu0 %vm118_vm1, %v442_v55 }
 0x3c1   :  { %1083 = vmatpush3.bf16.msra.mxu0 %v1309_v28  ;;  %1018 = vmatprep.mubr.msk.f32.mxu0 %vm1160_vm2, %v1161_v30 }
 0x3c2   :  { %1084 = vmatprep.subr.bf16.mxu0 %v1159_v27 }
 0x3c5   :  { %1086 = vmatpush3.bf16.msra.mxu0 %v1320_v31 }
 0x3c6   :  { %1093 = vmatprep.subr.bf16.mxu0 %v1159_v27 }
 0x493   :  { %v511_v56 = vpop.f32.mrb[4].mxu0 }
 0x494   :  { %v515_v57 = vadd.f32 %v511_v56, %v1332_v34  ;;  %v998_v58 = vpop.f32.mrb[5].mxu0 }
 0x496   :  { %1112 = vtanh.f32 %v515_v57 }
 0x4a0   :  { %v1113_v59 = vpop.eup %1112 }
 0x4a1   :  { %1008 = vmatmul.mubr.msk.f32.vlgmr.msra.gmra.mrb[4].mxu1 %vm118_vm1, %v1113_v59 }
 0x4a2   :  { %1089 = vmatpush3.bf16.msra.mxu1 %v1309_v28  ;;  %1029 = vmatprep.mubr.msk.f32.mxu1 %vm1160_vm2, %v1161_v30 }
 0x4a3   :  { %1090 = vmatprep.subr.bf16.mxu1 %v1159_v27 }
 0x4a6   :  { %1092 = vmatpush3.bf16.msra.mxu1 %v1320_v31 }
 0x574   :  { %v586_v60 = vpop.f32.mrb[4].mxu1 }
 0x575   :  { %v591_v61 = vrot.slane %v586_v60, 6  ;;  %v1009_v62 = vpop.f32.mrb[5].mxu1 }
 0x577   :  { %v593_v63 = vadd.f32 %v591_v61, %v1332_v34 }
 0x579   :  { %1114 = vtanh.f32 %v593_v63 }
 0x583   :  { %v1115_v0 = vpop.eup %1114 }
 0x584   :  { %v596_v1 = vrot.slane %v1115_v0, 2 }
 0x586   :  { %1019 = vmatmul.mubr.msk.f32.vlgmr.msra.gmra.mrb[6].mxu0 %vm118_vm1, %v596_v1 }
 0x587   :  { %1040 = vmatprep.mubr.msk.f32.mxu0 %vm1160_vm2, %v1161_v30  ;;  %1095 = vmatpush3.bf16.msra.mxu0 %v1094_v10 }
 0x588   :  { %1096 = vmatprep.subr.bf16.mxu0 %v1159_v27 }
 0x58b   :  { %1098 = vmatpush3.bf16.msra.mxu0 %v1097_v13 }
 0x659   :  { %v665_v2 = vpop.f32.mrb[6].mxu0 }
 0x65a   :  { %v670_v3 = vrot.slane %v665_v2, 4  ;;  %v1020_v4 = vpop.f32.mrb[7].mxu0 }
 0x65c   :  { %v672_v5 = vadd.f32 %v670_v3, %v1332_v34 }
 0x65e   :  { %1116 = vtanh.f32 %v672_v5 }
 0x668   :  { %v1117_v6 = vpop.eup %1116 }
 0x669   :  { %v675_v7 = vrot.slane %v1117_v6, 4 }
 0x66b   :  { %1030 = vmatmul.mubr.msk.f32.vlgmr.msra.gmra.mrb[6].mxu1 %vm118_vm1, %v675_v7 }
 0x73e   :  { %v744_v14 = vpop.f32.mrb[6].mxu1 }
 0x73f   :  { %v749_v15 = vrot.slane %v744_v14, 2  ;;  %v1031_v16 = vpop.f32.mrb[7].mxu1 }
 0x741   :  { %v751_v17 = vadd.f32 %v749_v15, %v1332_v34 }
 0x743   :  { %1118 = vtanh.f32 %v751_v17 }
 0x74d   :  { %v1119_v18 = vpop.eup %1118 }
 0x74e   :  { %v765_v19 = vrot.slane %v1119_v18, 6 }
 0x750   :  { %1041 = vmatmul.mubr.msk.f32.vlgmr.msra.gmra.mrb[8].mxu0 %vm118_vm1, %v765_v19 }
 0x823   :  { %v834_v21 = vpop.f32.mrb[8].mxu0 }
 0x824   :  { %v835_v22 = vadd.f32 %v896_v20, %v834_v21  ;;  %v1042_v23 = vpop.f32.mrb[9].mxu0 }
 0x826   :  { %839 = vst.msk [vmem:[#allocation6] sm:$0x3] %vm838_vm3, %v835_v22 }
 0x827   :  { %1143 = shalt.err (!%p1140_p9)
}
 0x828   :  { %s1144_s29 = scalar_lea.hbm %s1412_s7, 32 }
 0x829   :  { %p1145_p10 = scmp.ne.s32.totalorder %s1412_s7, %s1144_s29  ;;  %p1148_p11 = scmp.lt.u32.totalorder %s1144_s29, %s1412_s7 }
 0x82b   :  { %p1150_p12 = pnand %p1148_p11, %p1145_p10 }
 0x82d   :  { %1153 = shalt.err (!%p1150_p12)
}
 0x82e   :  { %849 = dma.vmem_to_hbm [thread:$0]  %s847_s16, 32, %s1412_s7, [#allocation4]  }
 0x82f   :  { %1156 = dma.done.wait [#allocation4], 32  }
 0x830   :  { %1157 = vsyncadd [#allocation4], 4294967264 }
 0x831   :  { %853 = vsyncpa [#allocation4], 1 }
 0x832   :  { %854 = vsyncpa [#allocation5], 1 }

</bundles_post_ra>
